<compile_context>
chip_gen: v5e
topology: v5e:2x2
jax: 0.10.0
libtpu: 0.0.40
codegen_flags: <defaults>
</compile_context>

<pallas_src>
import jax
import jax.numpy as jnp
from jax.experimental import pallas as pl
from jax.experimental.pallas import tpu as pltpu


def _round_up(n, m):
    return ((n + m - 1) // m) * m


# --------------------------- parameter packing --------------------------------


def pack_params(flow_params, g_params):
    """Pack all (transposed) weights/biases into one (rows, width) f32 slab.

    Returns (packed, flow_meta, g_meta). Metadata entries are static
    (row_offset, rows, cols) tuples used for static in-kernel slicing.
    Row offsets are 8-aligned so every slice stays sublane-tile aligned.
    """
    blocks = []
    cursor = [0]

    def add(a):
        a = jnp.asarray(a, jnp.float32)
        off = cursor[0]
        blocks.append((off, a))
        cursor[0] = off + _round_up(a.shape[0], 8)
        return (off, a.shape[0], a.shape[1])

    def add_mlp(mlp):
        metas = []
        for i, (W, b) in enumerate(mlp):
            if i == 0:
                A = add(W[:-1, :].T)      # (H, F_in)  feature part of first linear
                at = add(W[-1:, :].T)     # (H, 1)     t column of first linear
            else:
                A = add(W.T)              # (H_out, H_in)
                at = None
            bb = add(jnp.reshape(b, (-1, 1)))   # (H, 1)
            metas.append((A, at, bb))
        return tuple(metas)

    flow_meta = []
    for layer in flow_params:
        mlp_meta = add_mlp(layer["mlp"])
        tw = add(layer["time_w"].T)                       # (D, 1)
        tb = add(jnp.reshape(layer["time_b"], (-1, 1)))   # (D, 1)
        flow_meta.append((mlp_meta, tw, tb))
    g_meta = add_mlp(g_params)

    rows = _round_up(cursor[0], 8)
    width = max(a.shape[1] for _, a in blocks)
    packed = jnp.zeros((rows, width), jnp.float32)
    for off, a in blocks:
        packed = packed.at[off:off + a.shape[0], :a.shape[1]].set(a)
    return packed, tuple(flow_meta), g_meta


# ------------------------------- kernel ---------------------------------------


def _make_kernel(flow_meta, g_meta, broadcast_x):
    """Kernel over transposed (feature, lane) tiles.

    Refs: x (1,D,TM) or (1,D,1) / t (1,1,TM) / w (1,D,TM) / packed params / out (1,D,TM).
    """

    def kernel(x_ref, t_ref, w_ref, p_ref, o_ref):
        def slab(meta):
            off, r, c = meta
            return p_ref[off:off + r, :c]          # static slice of packed weights

        t = t_ref[0]                               # (1, TM)
        w = w_ref[0]                               # (D, TM)

        if broadcast_x:
            # seq=1 input: broadcast the single column across lanes in-VMEM
            # instead of materializing the repeat in HBM.
            x = jnp.broadcast_to(x_ref[0], w.shape)
        else:
            x = x_ref[0]                           # (D, TM)

        def mlp_T(inp, metas):
            # MLP over concat([inp, t]) in transposed form, concat never materialized:
            #   first layer = A0 @ inp  +  (t column) * t  +  b0
            A0, at0, b0 = metas[0]
            h = (jnp.dot(slab(A0), inp, preferred_element_type=jnp.float32)
                 + slab(at0) * t                   # K=1 matmul -> VPU broadcast
                 + slab(b0))
            if len(metas) == 1:
                return h
            h = jnp.tanh(h)
            for A, _, b in metas[1:-1]:
                h = jnp.tanh(jnp.dot(slab(A), h, preferred_element_type=jnp.float32)
                             + slab(b))
            AL, _, bL = metas[-1]
            return jnp.dot(slab(AL), h, preferred_element_type=jnp.float32) + slab(bL)

        # f(x, t): ResNet flow layers
        for mlp_meta, tw, tb in flow_meta:
            phi = jnp.tanh(slab(tw) * t + slab(tb))        # (D, TM), TimeTanh on VPU/EUP
            x = x + phi * mlp_T(x, mlp_meta)

        # g(w, t): MLP on concat([w, t])
        o_ref[0] = (x + mlp_T(w, g_meta)).astype(o_ref.dtype)

    return kernel


# ------------------------------- wrapper ---------------------------------------


def stochastic_flow(x, t, w, flow_params, g_params, *, tile_n=1024):
    """x: (B, Sx, D) with Sx in {1, S}; t: (B, S, 1); w: (B, S, D) -> (B, S, D)."""
    B, S, D = w.shape
    broadcast_x = x.shape[-2] == 1

    # Transposed, lane-dense layouts: features on sublanes, sequence on lanes.
    xT = jnp.swapaxes(x, -1, -2)              # (B, D, Sx)
    tT = jnp.swapaxes(t, -1, -2)              # (B, 1, S)
    wT = jnp.swapaxes(w, -1, -2)              # (B, D, S)

    # Lane tile: multiple of 128; keep the double-buffered x/t/w/out blocks well
    # under a few MiB so the kernel stays portable to v7x's smaller VMEM.
    bytes_per_lane = 4 * (3 * D + 1) * 2       # x + w + out + t, double-buffered
    vmem_cap = max(128, ((4 << 20) // bytes_per_lane) // 128 * 128)
    TM = min(max(128, (tile_n // 128) * 128), _round_up(S, 128), vmem_cap)
    Sp = _round_up(S, TM)

    if Sp != S:
        pad = ((0, 0), (0, 0), (0, Sp - S))
        tT = jnp.pad(tT, pad)
        wT = jnp.pad(wT, pad)
        if not broadcast_x:
            xT = jnp.pad(xT, pad)

    packed, flow_meta, g_meta = pack_params(flow_params, g_params)
    kernel = _make_kernel(flow_meta, g_meta, broadcast_x)

    if broadcast_x:
        x_spec = pl.BlockSpec((1, D, 1), lambda b, s: (b, 0, 0))
    else:
        x_spec = pl.BlockSpec((1, D, TM), lambda b, s: (b, 0, s))

    outT = pl.pallas_call(
        kernel,
        out_shape=jax.ShapeDtypeStruct((B, D, Sp), w.dtype),
        grid_spec=pltpu.PrefetchScalarGridSpec(
            num_scalar_prefetch=0,
            grid=(B, Sp // TM),
            in_specs=[
                x_spec,
                pl.BlockSpec((1, 1, TM), lambda b, s: (b, 0, s)),
                pl.BlockSpec((1, D, TM), lambda b, s: (b, 0, s)),
                pl.BlockSpec(packed.shape, lambda b, s: (0, 0)),   # whole weight slab
            ],
            out_specs=pl.BlockSpec((1, D, TM), lambda b, s: (b, 0, s)),
        ),
        compiler_params=pltpu.CompilerParams(
            dimension_semantics=("parallel", "parallel"),
        ),
    )(xT, tT, wT, packed)

    return jnp.swapaxes(outT[:, :, :S], -1, -2)


# ------------------------ deterministic parameter init -------------------------


def init_params(key, dim, hidden_dims, n_layers):
    def linear(k, fan_in, fan_out):
        k1, k2 = jax.random.split(k)
        bound = 1.0 / jnp.sqrt(jnp.float32(fan_in))
        W = jax.random.uniform(k1, (fan_in, fan_out), jnp.float32, -bound, bound)
        b = jax.random.uniform(k2, (1, fan_out), jnp.float32, -bound, bound)
        return W, b

    dims = [dim + 1] + list(hidden_dims) + [dim]
    keys = jax.random.split(key, n_layers + 1)

    flow_params = []
    for l in range(n_layers):
        lk = jax.random.split(keys[l], len(dims))
        mlp = [linear(lk[i], dims[i], dims[i + 1]) for i in range(len(dims) - 1)]
        tw, tb = linear(lk[-1], 1, dim)   # TimeTanh: Linear(1, dim)
        flow_params.append({"mlp": mlp, "time_w": tw, "time_b": tb})

    gk = jax.random.split(keys[-1], len(dims) - 1)
    g_params = [linear(gk[i], dims[i], dims[i + 1]) for i in range(len(dims) - 1)]
    return flow_params, g_params


# ------------------------------ pure-JAX reference ------------------------------


def reference(x, t, w, flow_params, g_params):
    if x.shape[-2] == 1:
        x = jnp.repeat(x, t.shape[-2], axis=-2)

    def mlp(inp, ws):
        h = inp
        for i, (W, b) in enumerate(ws):
            h = h @ W + b
            if i < len(ws) - 1:
                h = jnp.tanh(h)
        return h

    for layer in flow_params:
        phi = jnp.tanh(t @ layer["time_w"] + layer["time_b"])
        x = x + phi * mlp(jnp.concatenate([x, t], -1), layer["mlp"])
    return x + mlp(jnp.concatenate([w, t], -1), g_params)


# ----------------------------------- main ---------------------------------------


if __name__ == "__main__":
    D = 4               # data dim
    HIDDEN = [32, 32]   # hidden_dims
    N_LAYERS = 2        # flow layers
    B, S = 2, 8         # batch, sequence length

    key = jax.random.PRNGKey(0)
    kp, kx, kt, kw, kx2 = jax.random.split(key, 5)

    flow_params, g_params = init_params(kp, D, HIDDEN, N_LAYERS)

    x1 = jax.random.normal(kx, (B, 1, D), jnp.float32)            # seq=1 -> in-kernel broadcast
    t = jnp.sort(jax.random.uniform(kt, (B, S, 1), jnp.float32), axis=-2)
    w = jax.random.normal(kw, (B, S, D), jnp.float32)
    x2 = jax.random.normal(kx2, (B, S, D), jnp.float32)            # full-sequence x path

    out1 = jax.block_until_ready(stochastic_flow(x1, t, w, flow_params, g_params))
    out2 = jax.block_until_ready(stochastic_flow(x2, t, w, flow_params, g_params))

    ref1 = reference(x1, t, w, flow_params, g_params)
    ref2 = reference(x2, t, w, flow_params, g_params)

    assert out1.shape == (B, S, D) and out2.shape == (B, S, D)
    assert jnp.allclose(out1, ref1, rtol=1e-5, atol=2e-5), "broadcast-x path mismatch"
    assert jnp.allclose(out2, ref2, rtol=1e-5, atol=2e-5), "full-seq-x path mismatch"

    print("KERNEL_OK")
</pallas_src>

<mosaic_0001>
module attributes {stable_mosaic.version = 11 : i64} {
  func.func @kernel(%arg0: i32, %arg1: i32, %arg2: memref<1x4x1xf32, #tpu.memory_space<vmem>>, %arg3: memref<1x1x128xf32, #tpu.memory_space<vmem>>, %arg4: memref<1x4x128xf32, #tpu.memory_space<vmem>>, %arg5: memref<560x32xf32, #tpu.memory_space<vmem>>, %arg6: memref<1x4x128xf32, #tpu.memory_space<vmem>>) attributes {dimension_semantics = [#tpu.dimension_semantics<parallel>, #tpu.dimension_semantics<parallel>], iteration_bounds = array<i64: 2, 1>, scalar_prefetch = 0 : i64, scratch_operands = 0 : i64, tpu.core_type = #tpu.core_type<tc>, window_params = [{transform_indices = @transform_0, window_bounds = array<i64: 1, 4, 1>}, {transform_indices = @transform_1, window_bounds = array<i64: 1, 1, 128>}, {transform_indices = @transform_2, window_bounds = array<i64: 1, 4, 128>}, {pipeline_mode = #tpu.pipeline_mode<synchronous>, transform_indices = @transform_3, window_bounds = array<i64: 560, 32>}, {transform_indices = @transform_4, window_bounds = array<i64: 1, 4, 128>}]} {
    %c0 = arith.constant 0 : index
    %c0_0 = arith.constant 0 : index
    %c0_1 = arith.constant 0 : index
    %0 = vector.load %arg3[%c0, %c0_0, %c0_1] : memref<1x1x128xf32, #tpu.memory_space<vmem>>, vector<1x1x128xf32>
    %1 = vector.shape_cast %0 : vector<1x1x128xf32> to vector<1x128xf32>
    %c0_2 = arith.constant 0 : index
    %c0_3 = arith.constant 0 : index
    %c0_4 = arith.constant 0 : index
    %2 = vector.load %arg4[%c0_2, %c0_3, %c0_4] : memref<1x4x128xf32, #tpu.memory_space<vmem>>, vector<1x4x128xf32>
    %3 = vector.shape_cast %2 : vector<1x4x128xf32> to vector<4x128xf32>
    %c0_5 = arith.constant 0 : index
    %c0_6 = arith.constant 0 : index
    %c0_7 = arith.constant 0 : index
    %4 = vector.load %arg2[%c0_5, %c0_6, %c0_7] : memref<1x4x1xf32, #tpu.memory_space<vmem>>, vector<1x4x1xf32>
    %5 = vector.shape_cast %4 : vector<1x4x1xf32> to vector<4x1xf32>
    %6 = vector.shape_cast %5 : vector<4x1xf32> to vector<4x1xf32>
    %7 = vector.broadcast %6 : vector<4x1xf32> to vector<4x128xf32>
    %c176 = arith.constant 176 : index
    %c0_8 = arith.constant 0 : index
    %8 = vector.load %arg5[%c176, %c0_8] : memref<560x32xf32, #tpu.memory_space<vmem>>, vector<4x1xf32>
    %9 = vector.broadcast %8 : vector<4x1xf32> to vector<4x128xf32>
    %10 = vector.broadcast %1 : vector<1x128xf32> to vector<4x128xf32>
    %11 = arith.mulf %9, %10 : vector<4x128xf32>
    %c184 = arith.constant 184 : index
    %c0_9 = arith.constant 0 : index
    %12 = vector.load %arg5[%c184, %c0_9] : memref<560x32xf32, #tpu.memory_space<vmem>>, vector<4x1xf32>
    %13 = vector.broadcast %12 : vector<4x1xf32> to vector<4x128xf32>
    %14 = arith.addf %11, %13 : vector<4x128xf32>
    %15 = math.tanh %14 : vector<4x128xf32>
    %c0_10 = arith.constant 0 : index
    %c0_11 = arith.constant 0 : index
    %16 = vector.load %arg5[%c0_10, %c0_11] : memref<560x32xf32, #tpu.memory_space<vmem>>, vector<32x4xf32>
    %cst = arith.constant dense<0.000000e+00> : vector<32x128xf32>
    %17 = tpu.matmul %16, %7, %cst {dimension_numbers = #tpu.dot_dimension_numbers<[1], [0], [0], [1], [0, 0, 1, 1], [], []>} : vector<32x4xf32>, vector<4x128xf32>, vector<32x128xf32> -> vector<32x128xf32>
    %c32 = arith.constant 32 : index
    %c0_12 = arith.constant 0 : index
    %18 = vector.load %arg5[%c32, %c0_12] : memref<560x32xf32, #tpu.memory_space<vmem>>, vector<32x1xf32>
    %19 = vector.broadcast %18 : vector<32x1xf32> to vector<32x128xf32>
    %20 = vector.broadcast %1 : vector<1x128xf32> to vector<32x128xf32>
    %21 = arith.mulf %19, %20 : vector<32x128xf32>
    %22 = arith.addf %17, %21 : vector<32x128xf32>
    %c64 = arith.constant 64 : index
    %c0_13 = arith.constant 0 : index
    %23 = vector.load %arg5[%c64, %c0_13] : memref<560x32xf32, #tpu.memory_space<vmem>>, vector<32x1xf32>
    %24 = vector.broadcast %23 : vector<32x1xf32> to vector<32x128xf32>
    %25 = arith.addf %22, %24 : vector<32x128xf32>
    %26 = math.tanh %25 : vector<32x128xf32>
    %c96 = arith.constant 96 : index
    %c0_14 = arith.constant 0 : index
    %27 = vector.load %arg5[%c96, %c0_14] : memref<560x32xf32, #tpu.memory_space<vmem>>, vector<32x32xf32>
    %cst_15 = arith.constant dense<0.000000e+00> : vector<32x128xf32>
    %28 = tpu.matmul %27, %26, %cst_15 {dimension_numbers = #tpu.dot_dimension_numbers<[1], [0], [0], [1], [0, 0, 1, 1], [], []>} : vector<32x32xf32>, vector<32x128xf32>, vector<32x128xf32> -> vector<32x128xf32>
    %c128 = arith.constant 128 : index
    %c0_16 = arith.constant 0 : index
    %29 = vector.load %arg5[%c128, %c0_16] : memref<560x32xf32, #tpu.memory_space<vmem>>, vector<32x1xf32>
    %30 = vector.broadcast %29 : vector<32x1xf32> to vector<32x128xf32>
    %31 = arith.addf %28, %30 : vector<32x128xf32>
    %32 = math.tanh %31 : vector<32x128xf32>
    %c160 = arith.constant 160 : index
    %c0_17 = arith.constant 0 : index
    %33 = vector.load %arg5[%c160, %c0_17] : memref<560x32xf32, #tpu.memory_space<vmem>>, vector<4x32xf32>
    %cst_18 = arith.constant dense<0.000000e+00> : vector<4x128xf32>
    %34 = tpu.matmul %33, %32, %cst_18 {dimension_numbers = #tpu.dot_dimension_numbers<[1], [0], [0], [1], [0, 0, 1, 1], [], []>} : vector<4x32xf32>, vector<32x128xf32>, vector<4x128xf32> -> vector<4x128xf32>
    %c168 = arith.constant 168 : index
    %c0_19 = arith.constant 0 : index
    %35 = vector.load %arg5[%c168, %c0_19] : memref<560x32xf32, #tpu.memory_space<vmem>>, vector<4x1xf32>
    %36 = vector.broadcast %35 : vector<4x1xf32> to vector<4x128xf32>
    %37 = arith.addf %34, %36 : vector<4x128xf32>
    %38 = arith.mulf %15, %37 : vector<4x128xf32>
    %39 = arith.addf %7, %38 : vector<4x128xf32>
    %c368 = arith.constant 368 : index
    %c0_20 = arith.constant 0 : index
    %40 = vector.load %arg5[%c368, %c0_20] : memref<560x32xf32, #tpu.memory_space<vmem>>, vector<4x1xf32>
    %41 = vector.broadcast %40 : vector<4x1xf32> to vector<4x128xf32>
    %42 = vector.broadcast %1 : vector<1x128xf32> to vector<4x128xf32>
    %43 = arith.mulf %41, %42 : vector<4x128xf32>
    %c376 = arith.constant 376 : index
    %c0_21 = arith.constant 0 : index
    %44 = vector.load %arg5[%c376, %c0_21] : memref<560x32xf32, #tpu.memory_space<vmem>>, vector<4x1xf32>
    %45 = vector.broadcast %44 : vector<4x1xf32> to vector<4x128xf32>
    %46 = arith.addf %43, %45 : vector<4x128xf32>
    %47 = math.tanh %46 : vector<4x128xf32>
    %c192 = arith.constant 192 : index
    %c0_22 = arith.constant 0 : index
    %48 = vector.load %arg5[%c192, %c0_22] : memref<560x32xf32, #tpu.memory_space<vmem>>, vector<32x4xf32>
    %cst_23 = arith.constant dense<0.000000e+00> : vector<32x128xf32>
    %49 = tpu.matmul %48, %39, %cst_23 {dimension_numbers = #tpu.dot_dimension_numbers<[1], [0], [0], [1], [0, 0, 1, 1], [], []>} : vector<32x4xf32>, vector<4x128xf32>, vector<32x128xf32> -> vector<32x128xf32>
    %c224 = arith.constant 224 : index
    %c0_24 = arith.constant 0 : index
    %50 = vector.load %arg5[%c224, %c0_24] : memref<560x32xf32, #tpu.memory_space<vmem>>, vector<32x1xf32>
    %51 = vector.broadcast %50 : vector<32x1xf32> to vector<32x128xf32>
    %52 = vector.broadcast %1 : vector<1x128xf32> to vector<32x128xf32>
    %53 = arith.mulf %51, %52 : vector<32x128xf32>
    %54 = arith.addf %49, %53 : vector<32x128xf32>
    %c256 = arith.constant 256 : index
    %c0_25 = arith.constant 0 : index
    %55 = vector.load %arg5[%c256, %c0_25] : memref<560x32xf32, #tpu.memory_space<vmem>>, vector<32x1xf32>
    %56 = vector.broadcast %55 : vector<32x1xf32> to vector<32x128xf32>
    %57 = arith.addf %54, %56 : vector<32x128xf32>
    %58 = math.tanh %57 : vector<32x128xf32>
    %c288 = arith.constant 288 : index
    %c0_26 = arith.constant 0 : index
    %59 = vector.load %arg5[%c288, %c0_26] : memref<560x32xf32, #tpu.memory_space<vmem>>, vector<32x32xf32>
    %cst_27 = arith.constant dense<0.000000e+00> : vector<32x128xf32>
    %60 = tpu.matmul %59, %58, %cst_27 {dimension_numbers = #tpu.dot_dimension_numbers<[1], [0], [0], [1], [0, 0, 1, 1], [], []>} : vector<32x32xf32>, vector<32x128xf32>, vector<32x128xf32> -> vector<32x128xf32>
    %c320 = arith.constant 320 : index
    %c0_28 = arith.constant 0 : index
    %61 = vector.load %arg5[%c320, %c0_28] : memref<560x32xf32, #tpu.memory_space<vmem>>, vector<32x1xf32>
    %62 = vector.broadcast %61 : vector<32x1xf32> to vector<32x128xf32>
    %63 = arith.addf %60, %62 : vector<32x128xf32>
    %64 = math.tanh %63 : vector<32x128xf32>
    %c352 = arith.constant 352 : index
    %c0_29 = arith.constant 0 : index
    %65 = vector.load %arg5[%c352, %c0_29] : memref<560x32xf32, #tpu.memory_space<vmem>>, vector<4x32xf32>
    %cst_30 = arith.constant dense<0.000000e+00> : vector<4x128xf32>
    %66 = tpu.matmul %65, %64, %cst_30 {dimension_numbers = #tpu.dot_dimension_numbers<[1], [0], [0], [1], [0, 0, 1, 1], [], []>} : vector<4x32xf32>, vector<32x128xf32>, vector<4x128xf32> -> vector<4x128xf32>
    %c360 = arith.constant 360 : index
    %c0_31 = arith.constant 0 : index
    %67 = vector.load %arg5[%c360, %c0_31] : memref<560x32xf32, #tpu.memory_space<vmem>>, vector<4x1xf32>
    %68 = vector.broadcast %67 : vector<4x1xf32> to vector<4x128xf32>
    %69 = arith.addf %66, %68 : vector<4x128xf32>
    %70 = arith.mulf %47, %69 : vector<4x128xf32>
    %71 = arith.addf %39, %70 : vector<4x128xf32>
    %c384 = arith.constant 384 : index
    %c0_32 = arith.constant 0 : index
    %72 = vector.load %arg5[%c384, %c0_32] : memref<560x32xf32, #tpu.memory_space<vmem>>, vector<32x4xf32>
    %cst_33 = arith.constant dense<0.000000e+00> : vector<32x128xf32>
    %73 = tpu.matmul %72, %3, %cst_33 {dimension_numbers = #tpu.dot_dimension_numbers<[1], [0], [0], [1], [0, 0, 1, 1], [], []>} : vector<32x4xf32>, vector<4x128xf32>, vector<32x128xf32> -> vector<32x128xf32>
    %c416 = arith.constant 416 : index
    %c0_34 = arith.constant 0 : index
    %74 = vector.load %arg5[%c416, %c0_34] : memref<560x32xf32, #tpu.memory_space<vmem>>, vector<32x1xf32>
    %75 = vector.broadcast %74 : vector<32x1xf32> to vector<32x128xf32>
    %76 = vector.broadcast %1 : vector<1x128xf32> to vector<32x128xf32>
    %77 = arith.mulf %75, %76 : vector<32x128xf32>
    %78 = arith.addf %73, %77 : vector<32x128xf32>
    %c448 = arith.constant 448 : index
    %c0_35 = arith.constant 0 : index
    %79 = vector.load %arg5[%c448, %c0_35] : memref<560x32xf32, #tpu.memory_space<vmem>>, vector<32x1xf32>
    %80 = vector.broadcast %79 : vector<32x1xf32> to vector<32x128xf32>
    %81 = arith.addf %78, %80 : vector<32x128xf32>
    %82 = math.tanh %81 : vector<32x128xf32>
    %c480 = arith.constant 480 : index
    %c0_36 = arith.constant 0 : index
    %83 = vector.load %arg5[%c480, %c0_36] : memref<560x32xf32, #tpu.memory_space<vmem>>, vector<32x32xf32>
    %cst_37 = arith.constant dense<0.000000e+00> : vector<32x128xf32>
    %84 = tpu.matmul %83, %82, %cst_37 {dimension_numbers = #tpu.dot_dimension_numbers<[1], [0], [0], [1], [0, 0, 1, 1], [], []>} : vector<32x32xf32>, vector<32x128xf32>, vector<32x128xf32> -> vector<32x128xf32>
    %c512 = arith.constant 512 : index
    %c0_38 = arith.constant 0 : index
    %85 = vector.load %arg5[%c512, %c0_38] : memref<560x32xf32, #tpu.memory_space<vmem>>, vector<32x1xf32>
    %86 = vector.broadcast %85 : vector<32x1xf32> to vector<32x128xf32>
    %87 = arith.addf %84, %86 : vector<32x128xf32>
    %88 = math.tanh %87 : vector<32x128xf32>
    %c544 = arith.constant 544 : index
    %c0_39 = arith.constant 0 : index
    %89 = vector.load %arg5[%c544, %c0_39] : memref<560x32xf32, #tpu.memory_space<vmem>>, vector<4x32xf32>
    %cst_40 = arith.constant dense<0.000000e+00> : vector<4x128xf32>
    %90 = tpu.matmul %89, %88, %cst_40 {dimension_numbers = #tpu.dot_dimension_numbers<[1], [0], [0], [1], [0, 0, 1, 1], [], []>} : vector<4x32xf32>, vector<32x128xf32>, vector<4x128xf32> -> vector<4x128xf32>
    %c552 = arith.constant 552 : index
    %c0_41 = arith.constant 0 : index
    %91 = vector.load %arg5[%c552, %c0_41] : memref<560x32xf32, #tpu.memory_space<vmem>>, vector<4x1xf32>
    %92 = vector.broadcast %91 : vector<4x1xf32> to vector<4x128xf32>
    %93 = arith.addf %90, %92 : vector<4x128xf32>
    %94 = arith.addf %71, %93 : vector<4x128xf32>
    %c0_42 = arith.constant 0 : index
    %c0_43 = arith.constant 0 : index
    %c0_44 = arith.constant 0 : index
    %95 = vector.load %arg6[%c0_42, %c0_43, %c0_44] : memref<1x4x128xf32, #tpu.memory_space<vmem>>, vector<1x4x128xf32>
    %96 = vector.shape_cast %95 : vector<1x4x128xf32> to vector<4x128xf32>
    %97 = vector.shape_cast %94 : vector<4x128xf32> to vector<1x4x128xf32>
    tpu.vector_store %arg6[%c0_42, %c0_43, %c0_44], %97 {strides = array<i32>} : memref<1x4x128xf32, #tpu.memory_space<vmem>>, vector<1x4x128xf32>,
    return
  }
  func.func @transform_0(%arg0: i32, %arg1: i32) -> (i32, i32, i32) {
    %c0_i32 = arith.constant 0 : i32
    %c0_i32_0 = arith.constant 0 : i32
    %c0_i32_1 = arith.constant 0 : i32
    return %arg0, %c0_i32, %c0_i32_0 : i32, i32, i32
  }
  func.func @transform_1(%arg0: i32, %arg1: i32) -> (i32, i32, i32) {
    %c0_i32 = arith.constant 0 : i32
    %c0_i32_0 = arith.constant 0 : i32
    return %arg0, %c0_i32, %arg1 : i32, i32, i32
  }
  func.func @transform_2(%arg0: i32, %arg1: i32) -> (i32, i32, i32) {
    %c0_i32 = arith.constant 0 : i32
    %c0_i32_0 = arith.constant 0 : i32
    return %arg0, %c0_i32, %arg1 : i32, i32, i32
  }
  func.func @transform_3(%arg0: i32, %arg1: i32) -> (i32, i32) {
    %c0_i32 = arith.constant 0 : i32
    %c0_i32_0 = arith.constant 0 : i32
    %c0_i32_1 = arith.constant 0 : i32
    return %c0_i32, %c0_i32_0 : i32, i32
  }
  func.func @transform_4(%arg0: i32, %arg1: i32) -> (i32, i32, i32) {
    %c0_i32 = arith.constant 0 : i32
    %c0_i32_0 = arith.constant 0 : i32
    return %arg0, %c0_i32, %arg1 : i32, i32, i32
  }
}

</mosaic_0001>

<bundles_post_ra>
// kernel: tpu_custom_call.1
= control target key start
LH: loop header
LB: loop body
LE: loop exit
PB: predicated region body
PF: predicated region fallthrough
CT: control target
= control target key end

     0   :  { %9 = vsyncpa [#allocation3], 0  ;;  %s1698_s0 = inlined_call_operand.vmem [shape: f32[2,4,1], index: 0, kind: input, shape index: {}]   ;;  %s1699_s1 = inlined_call_operand.vmem [shape: f32[2,1,128], index: 1, kind: input, shape index: {}]   ;;  %s1700_s2 = inlined_call_operand.vmem [shape: f32[2,4,128], index: 2, kind: input, shape index: {}]   ;;  %s1701_s3 = inlined_call_operand.vmem [shape: f32[560,32], index: 3, kind: input, shape index: {}]   ;;  %s1702_s4 = inlined_call_operand.hbm [shape: f32[2,4,128], index: 4, kind: output, shape index: {}]  }
   0x1   :  { %11 = vsyncpa [#allocation3 + $0x1], 0  ;;  %s1318_s15 = smov 0   ;;  %s1320_s16 = smov 0  }
   0x2   :  { %s1322_s17 = smov 0   ;;  %s1324_s18 = smov 0  }
   0x3   :  { %s1326_s19 = smov 0   ;;  %s1328_s20 = smov 0  }
   0x4 LB: > { %s1054_s21 = sadd.s32 4294967295, %s1290_s20   ;;  %s1055_s22 = sadd.s32 4294967294, %s1290_s20   ;;  %s1290_s20 = sphi %s1328_s20, %s17_s20   ;;  %s1286_s19 = sphi %s1326_s19, %s1709_s19   ;;  %s1282_s18 = sphi %s1324_s18, %s1708_s18   ;;  %s1278_s17 = sphi %s1322_s17, %s1707_s17   ;;  %s1274_s16 = sphi %s1320_s16, %s1706_s16   ;;  %s1270_s15 = sphi %s1318_s15, %s1705_s15  }
   0x5   : > { %s29_s23 = sadd.s32 1, %s1286_s19  ;;  %s141_s24 = sadd.s32 1, %s1278_s17 }
   0x6   : > { %p31_p0 = scmp.ge.s32.totalorder %s29_s23, 2  ;;  %p151_p1 = scmp.ne.s32.totalorder %s1278_s17, %s1274_s16 }
   0x7   : > { %p152_p2 = scmp.eq.s32.totalorder %s1054_s21, 1  ;;  %p157_p3 = scmp.ne.s32.totalorder %s1274_s16, %s1270_s15 }
   0x8   : > { %s1711_s23 = smov (%p31_p0, %s29_s23), 0  ;;  %p158_p5 = scmp.eq.s32.totalorder %s1055_s22, 1 }
   0x9   : > { %p1358_p4 = por %p152_p2, %p151_p1  ;;  %s136_s26 = ssub.s32 %s1286_s19, %s1711_s23 }
   0xa   : > { %p1058_p6 = scmp.ge.s32.totalorder %s1290_s20, 1  ;;  %p139_p7 = scmp.eq.s32.totalorder %s136_s26, 0 }
   0xb   : > { %p1365_p8 = por %p158_p5, %p157_p3  ;;  %p205_p9 = scmp.lt.s32.totalorder %s1290_s20, 3 }
   0xc   : > { %s1371_s28 = scalar_select %p139_p7, %s1278_s17, %s141_s24  }
   0xd   : > { %p206_p10 = pnand %p1058_p6, %p205_p9 }
   0xe   : > { %p243_p11 = scmp.lt.s32.totalorder (!%p206_p10), %s1282_s18, 1  ;;  %s1093_s26 = sshll.u32 (!%p206_p10), %s1282_s18, 2 }
   0xf   : > { %209 = sbr.rel (%p206_p10) target bundleno = 1109 (0x455), region = 36  ;;  %s954_s7 = scalar_lea.hbm (!%p206_p10), %s1702_s4, %s1093_s26 }
  0x10   : > { %s958_s11 = sshll.u32 (!%p206_p10), %s954_s7, 4  ;;  %s959_s11 = int_to_ptr.hbm [resolvable:$true] %s958_s11 }
  0x14   : > { %v1292_v0 = vmov 0   ;;  %v292_v1 = vld [vmem:[%s1701_s3 + $0x30] sm:$0xff]  ;;  %s1378_s5 = scalar_select %p243_p11, %s1282_s18, 1  ;;  %v291_v3 = vld [vmem:[%s1701_s3 + $0x28] sm:$0xff]  ;;  %v293_v4 = vld [vmem:[%s1701_s3 + $0x38] sm:$0xff]  ;;  %vm331_vm0 = vcmask 1043456  }
  0x15   : > { %1156 = vset.pattern.permute.xlu0 %v1292_v0  ;;  %1157 = vset.pattern.permute.xlu1 %v1292_v0  ;;  %v364_v5 = vld [vmem:[%s1701_s3 + $0x48] sm:$0xff]  ;;  %v365_v6 = vld [vmem:[%s1701_s3 + $0x50] sm:$0xff]  ;;  %v402_v8 = vld [vmem:[%s1701_s3 + $0x98] sm:$0xff]  ;;  %vm318_vm1 = vcmask 31744   ;;  %vm423_vm2 = vcmask 261120  }
  0x16   : > { %306 = vperm.xlu1 %1157, %v292_v1   ;;  %1158 = vset.pattern.permute.xlu2 %v1292_v0  ;;  %s1060_s6 = sshll.u32 %s1378_s5, 2  ;;  %s252_s9 = scalar_lea.vmem %s1699_s1, %s1378_s5  ;;  %v401_v7 = vld [vmem:[%s1701_s3 + $0x90] sm:$0xff]  ;;  %v366_v10 = vld [vmem:[%s1701_s3 + $0x58] sm:$0xff]  ;;  %v399_v11 = vld [vmem:[%s1701_s3 + $0x80] sm:$0xff] }
  0x17   : > { %s246_s12 = scalar_lea.vmem %s1698_s0, %s1060_s6  ;;  %v268_v9 = vld [vmem:[%s1701_s3 + $0xb0] sm:$0xf]  ;;  %384 = vperm.xlu2 %1158, %v366_v10   ;;  %v523_v12 = vld [vmem:[%s1701_s3 + $0xf8] sm:$0xff]  ;;  %v290_v13 = vld [vmem:[%s1701_s3 + $0x20] sm:$0xff]  ;;  %s259_s14 = scalar_lea.vmem %s1700_s2, %s1060_s6 }
  0x18   : > { %v262_v2 = vld [vmem:[%s246_s12] sm:$0xf]  ;;  %v470_v14 = vld [vmem:[%s1701_s3 + $0xa8] sm:$0xf]  ;;  %v595_v15 = vld [vmem:[%s1701_s3 + $0x118] sm:$0xff]  ;;  %s240_s6 = sand.u32 1, %s1274_s16  }
  0x19   : > { %265 = vperm.xlu0 %1156, %v262_v2   ;;  %v363_v16 = vld [vmem:[%s1701_s3 + $0x40] sm:$0xff]  ;;  %v521_v17 = vld [vmem:[%s1701_s3 + $0xe8] sm:$0xff]  ;;  %v594_v20 = vld [vmem:[%s1701_s3 + $0x110] sm:$0xff]  ;;  %s1059_s24 = sshll.u32 %s240_s6, 2  ;;  %s943_s18 = scalar_lea.sflag [#allocation3], %s240_s6 }
  0x1a   : > { %v593_v18 = vld [vmem:[%s1701_s3 + $0x108] sm:$0xff]  ;;  %v735_v21 = vld [vmem:[%s1701_s3 + $0x1b0] sm:$0xff]  ;;  %v278_v22 = vld [vmem:[%s1701_s3 + $0xb8] sm:$0xf]  ;;  %s242_s8 = scalar_lea.vmem [#allocation2], %s1059_s24  ;;  %s1226_s12 = sshra.s32 %s959_s11, 4  ;;  %s1227_s12 = int_to_ptr.hbm [resolvable:$true] %s1226_s12 }
  0x1b   : > { %v400_v19 = vld [vmem:[%s1701_s3 + $0x88] sm:$0xff]  ;;  %v736_v23 = vld [vmem:[%s1701_s3 + $0x1b8] sm:$0xff]  ;;  %v733_v24 = vld [vmem:[%s1701_s3 + $0x1a0] sm:$0xff]  ;;  %s956_s10 = sshll.u32 %s242_s8, 4  ;;  %s1228_s13 = scalar_lea.hbm %s1227_s12, 4  ;;  %s957_s10 = int_to_ptr.vmem [resolvable:$true] %s956_s10 }
  0x1c   : > { %v522_v25 = vld [vmem:[%s1701_s3 + $0xf0] sm:$0xff]  ;;  %v808_v26 = vld [vmem:[%s1701_s3 + $0x1d8] sm:$0xff]  ;;  %v805_v27 = vld [vmem:[%s1701_s3 + $0x1c0] sm:$0xff]  ;;  %p1229_p12 = scmp.ne.s32.totalorder %s1227_s12, %s1228_s13  ;;  %p1233_p1 = scmp.lt.s32.totalorder %s1227_s12, %s1702_s4 }
  0x1d   : > { %v520_v28 = vld [vmem:[%s1701_s3 + $0xe0] sm:$0xff]  ;;  %v806_v29 = vld [vmem:[%s1701_s3 + $0x1c8] sm:$0xff]  ;;  %v630_v32 = vld [vmem:[%s1701_s3 + $0x150] sm:$0xff] }
  0x1e   : > { %301 = vperm.xlu1 %1157, %v291_v3   ;;  %v629_v30 = vld [vmem:[%s1701_s3 + $0x148] sm:$0xff]  ;;  %v592_v31 = vld [vmem:[%s1701_s3 + $0x100] sm:$0xff]  ;;  %v843_v33 = vld [vmem:[%s1701_s3 + $0x210] sm:$0xff]  ;;  %p1230_p13 = pnand %p1229_p12, %p1358_p4 }
  0x1f   : > { %296 = vperm.xlu2 %1158, %v290_v13   ;;  %v734_v34 = vld [vmem:[%s1701_s3 + $0x1a8] sm:$0xff]  ;;  %v844_v35 = vld [vmem:[%s1701_s3 + $0x218] sm:$0xff]  ;;  %v501_v36 = vld [vmem:[%s1701_s3 + $0x170] sm:$0xf] }
  0x20   : > { %v807_v37 = vld [vmem:[%s1701_s3 + $0x1d0] sm:$0xff]  ;;  %v841_v38 = vld [vmem:[%s1701_s3 + $0x200] sm:$0xff]  ;;  %v911_v39 = vld [vmem:[%s1701_s3 + $0x228] sm:$0xf]  ;;  %p1231_p0 = pneg %p1230_p13 }
  0x21   : > { %311 = vperm.xlu0 %1156, %v293_v4   ;;  %v631_v40 = vld [vmem:[%s1701_s3 + $0x158] sm:$0xff]  ;;  %v698_v41 = vld [vmem:[%s1701_s3 + $0x168] sm:$0xf]  ;;  %v286_v42 = vld [vmem:[%s1701_s3] sm:$0xff] }
  0x22   : > { %v628_v44 = vld [vmem:[%s1701_s3 + $0x140] sm:$0xff]  ;;  %v287_v45 = vld [vmem:[%s1701_s3 + $0x8] sm:$0xff]  ;;  %v288_v47 = vld [vmem:[%s1701_s3 + $0x10] sm:$0xff] }
  0x23   : > { %v842_v46 = vld [vmem:[%s1701_s3 + $0x208] sm:$0xff]  ;;  %v508_v48 = vld [vmem:[%s1701_s3 + $0x178] sm:$0xf]  ;;  %v1541_v56 = vld [vmem:[%s252_s9] ss:$0 sm:$0xff]  ;;  %s1232_s9 = scalar_lea.hbm %s1702_s4, 8 }
  0x24   : > { %v289_v49 = vld [vmem:[%s1701_s3 + $0x18] sm:$0xff]  ;;  %p1234_p2 = scmp.lt.s32.totalorder %s1232_s9, %s1228_s13 }
  0x26   : > { %374 = vperm.xlu1 %1157, %v364_v5   ;;  %p1235_p3 = por %p1234_p2, %p1233_p1 }
  0x27   : > { %369 = vperm.xlu2 %1158, %v363_v16  }
  0x28   : > { %p1236_p5 = pnand %p1235_p3, %p1231_p0 }
  0x29   : > { %379 = vperm.xlu0 %1156, %v365_v6  }
  0x2e   : > { %415 = vperm.xlu1 %1157, %v401_v7  }
  0x2f   : > { %410 = vperm.xlu2 %1158, %v400_v19  }
  0x31   : > { %420 = vperm.xlu0 %1156, %v402_v8  }
  0x36   : > { %271 = vperm.xlu1 %1157, %v268_v9  }
  0x37   : > { %281 = vperm.xlu2 %1158, %v278_v22  }
  0x39   : > { %405 = vperm.xlu0 %1156, %v399_v11  }
  0x3e   : > { %541 = vperm.xlu1 %1157, %v523_v12  }
  0x3f   : > { %536 = vperm.xlu2 %1158, %v522_v25  }
  0x41   : > { %473 = vperm.xlu0 %1156, %v470_v14   ;;  %v395_v14 = vld [vmem:[%s1701_s3 + $0x60] sm:$0xff] }
  0x46   : > { %613 = vperm.xlu1 %1157, %v595_v15   ;;  %v398_v15 = vld [vmem:[%s1701_s3 + $0x78] sm:$0xff] }
  0x47   : > { %526 = vperm.xlu2 %1158, %v520_v28  }
  0x49   : > { %531 = vperm.xlu0 %1156, %v521_v17   ;;  %v396_v17 = vld [vmem:[%s1701_s3 + $0x68] sm:$0xff] }
  0x4e   : > { %603 = vperm.xlu1 %1157, %v593_v18   ;;  %v397_v18 = vld [vmem:[%s1701_s3 + $0x70] sm:$0xff] }
  0x4f   : > { %598 = vperm.xlu2 %1158, %v592_v31  }
  0x51   : > { %608 = vperm.xlu0 %1156, %v594_v20  }
  0x56   : > { %749 = vperm.xlu1 %1157, %v735_v21  }
  0x57   : > { %744 = vperm.xlu2 %1158, %v734_v34   ;;  %v469_v34 = vld [vmem:[%s1701_s3 + $0xa0] sm:$0xf] }
  0x59   : > { %754 = vperm.xlu0 %1156, %v736_v23  }
  0x5e   : > { %739 = vperm.xlu1 %1157, %v733_v24  }
  0x5f   : > { %821 = vperm.xlu2 %1158, %v807_v37  }
  0x61   : > { %826 = vperm.xlu0 %1156, %v808_v26  }
  0x66   : > { %811 = vperm.xlu1 %1157, %v805_v27  }
  0x67   : > { %649 = vperm.xlu2 %1158, %v631_v40  }
  0x69   : > { %816 = vperm.xlu0 %1156, %v806_v29  }
  0x6e   : > { %639 = vperm.xlu1 %1157, %v629_v30  }
  0x6f   : > { %634 = vperm.xlu2 %1158, %v628_v44  }
  0x71   : > { %644 = vperm.xlu0 %1156, %v630_v32   ;;  %v385_v53 = vpop.permute.xlu2 %384 }
  0x76   : > { %857 = vperm.xlu1 %1157, %v843_v33  }
  0x77   : > { %852 = vperm.xlu2 %1158, %v842_v46  }
  0x79   : > { %862 = vperm.xlu0 %1156, %v844_v35   ;;  %v297_v59 = vpop.permute.xlu2 %296 }
  0x7a   : > { %v314_v62 = vmul.f32 %v1541_v56, %v297_v59 }
  0x7e   : > { %504 = vperm.xlu1 %1157, %v501_v36  }
  0x7f   : > { %511 = vperm.xlu2 %1158, %v508_v48   ;;  %v261_v48 = vld [vmem:[%s259_s14] sm:$0xf] }
  0x81   : > { %847 = vperm.xlu0 %1156, %v841_v38   ;;  %v370_v9 = vpop.permute.xlu2 %369 }
  0x86   : > { %914 = vperm.xlu1 %1157, %v911_v39  }
  0x88   : > { %v307_v51 = vpop.permute.xlu1 %306 }
  0x89   : > { %701 = vperm.xlu0 %1156, %v698_v41   ;;  %v316_v58 = vmul.f32 %v1541_v56, %v307_v51  ;;  %v411_v26 = vpop.permute.xlu2 %410  ;;  %v729_v51 = vld [vmem:[%s1701_s3 + $0x180] sm:$0xff] }
  0x8b   : > { %v1510_v43 = vpop.permute.xlu0 %265 }
  0x8c   : > { %1062 = vmatpush.msk.msra.mxu0 %vm331_vm0, %v1510_v43 }
  0x8d   : > { %1063 = vmatmul.msk.f32.vlgmr.msra.gmra.mxu0 %vm318_vm1, %v286_v42 }
  0x90   : > { %v302_v57 = vpop.permute.xlu1 %301 }
  0x91   : > { %v315_v60 = vmul.f32 %v1541_v56, %v302_v57  ;;  %v282_v38 = vpop.permute.xlu2 %281 }
  0x93   : > { %v312_v54 = vpop.permute.xlu0 %311 }
  0x94   : > { %v317_v61 = vmul.f32 %v1541_v56, %v312_v54  ;;  %v732_v54 = vld [vmem:[%s1701_s3 + $0x198] sm:$0xff] }
  0x95   : > { %1064 = vmatmul.msk.f32.gmra.mxu0 %vm318_vm1, %v287_v45 }
  0x98   : > { %v375_v7 = vpop.permute.xlu1 %374 }
  0x99   : > { %v537_v59 = vpop.permute.xlu2 %536 }
  0x9b   : > { %v380_v3 = vpop.permute.xlu0 %379 }
  0x9d   : > { %1065 = vmatmul.msk.f32.gmra.mxu0 %vm318_vm1, %v288_v47  ;;  %v516_v47 = vld [vmem:[%s1701_s3 + $0xc0] sm:$0xff] }
  0xa0   : > { %v416_v25 = vpop.permute.xlu1 %415 }
  0xa3   : > { %v421_v20 = vpop.permute.xlu0 %420 }
  0xa5   : > { %1066 = vmatmul.msk.f32.gmra.mxu0 %vm318_vm1, %v289_v49  ;;  %v517_v49 = vld [vmem:[%s1701_s3 + $0xc8] sm:$0xff] }
  0xa8   : > { %v272_v36 = vpop.permute.xlu1 %271 }
  0xa9   : > { %v277_v37 = vmul.f32 %v1541_v56, %v272_v36 }
  0xab   : > { %v406_v30 = vpop.permute.xlu0 %405  ;;  %v284_v39 = vadd.f32 %v282_v38, %v277_v37 }
  0xb0   : > { %v542_v57 = vpop.permute.xlu1 %541 }
  0xb3   : > { %v474_v40 = vpop.permute.xlu0 %473 }
 0x10a   : > { %v351_v50 = vpop.f32.mrf.mxu0 }
 0x10b   : > { %v352_v4 = vadd.f32 %v351_v50, %v314_v62  ;;  %v519_v50 = vld [vmem:[%s1701_s3 + $0xd8] sm:$0xff]  ;;  %v614_v62 = vpop.permute.xlu1 %613 }
 0x10d   : > { %v387_v10 = vadd.f32 %v370_v9, %v352_v4 }
 0x112   : > { %v354_v52 = vpop.f32.mrf.mxu0 }
 0x113   : > { %v355_v1 = vadd.f32 %v354_v52, %v315_v60  ;;  %v730_v52 = vld [vmem:[%s1701_s3 + $0x188] sm:$0xff]  ;;  %v532_v60 = vpop.permute.xlu0 %531 }
 0x115   : > { %v388_v8 = vadd.f32 %v375_v7, %v355_v1  ;;  %v545_v1 = vmul.f32 %v1541_v56, %v532_v60 }
 0x11a   : > { %v357_v55 = vpop.f32.mrf.mxu0 }
 0x11b   : > { %v358_v63 = vadd.f32 %v357_v55, %v316_v58 }
 0x11d   : > { %v389_v5 = vadd.f32 %v380_v3, %v358_v63  ;;  %v527_v63 = vpop.permute.xlu2 %526 }
 0x122   : > { %v360_v0 = vpop.f32.mrf.mxu0 }
 0x123   : > { %v361_v2 = vadd.f32 %v360_v0, %v317_v61  ;;  %v546_v0 = vmul.f32 %v1541_v56, %v537_v59 }
 0x125   : > { %v390_v6 = vadd.f32 %v385_v53, %v361_v2  ;;  %v731_v53 = vld [vmem:[%s1701_s3 + $0x190] sm:$0xff]  ;;  %v547_v2 = vmul.f32 %v1541_v56, %v542_v57  ;;  %v840_v57 = vld [vmem:[%s1701_s3 + $0x1f8] sm:$0xff] }
 0x127   : > { %1160 = vtanh.f32 %v390_v6 }
 0x128   : > { %1162 = vtanh.f32 %v389_v5  ;;  %v544_v5 = vmul.f32 %v1541_v56, %v527_v63 }
 0x129   : > { %1164 = vtanh.f32 %v388_v8  ;;  %v609_v8 = vpop.permute.xlu0 %608 }
 0x12a   : > { %1166 = vtanh.f32 %v387_v10 }
 0x12d   : > { %v1161_v11 = vpop.eup %1160 }
 0x12e   : > { %448 = vmatpush.msra.mxu1 %v1161_v11  ;;  %1096 = vmatpush.msra.mxu2 %v1161_v11  ;;  %v1163_v12 = vpop.eup %1162 }
 0x12f   : > { %v1165_v13 = vpop.eup %1164 }
 0x130   : > { %449 = vmatpush.msra.mxu1 %v1163_v12  ;;  %1097 = vmatpush.msra.mxu2 %v1163_v12  ;;  %v1167_v16 = vpop.eup %1166  ;;  %v604_v12 = vpop.permute.xlu1 %603 }
 0x132   : > { %450 = vmatpush.msra.mxu1 %v1165_v13  ;;  %1098 = vmatpush.msra.mxu2 %v1165_v13 }
 0x134   : > { %451 = vmatpush.msra.mxu1 %v1167_v16  ;;  %1099 = vmatpush.msra.mxu2 %v1167_v16 }
 0x135   : > { %1067 = vmatmul.msk.f32.vlgmr.msra.gmra.mxu1 %vm423_vm2, %v395_v14  ;;  %1070 = vmatmul.msk.f32.vlgmr.msra.gmra.mxu2 %vm423_vm2, %v398_v15  ;;  %v599_v14 = vpop.permute.xlu2 %598 }
 0x13d   : > { %1068 = vmatmul.msk.f32.gmra.mxu1 %vm423_vm2, %v396_v17 }
 0x145   : > { %1069 = vmatmul.msk.f32.gmra.mxu1 %vm423_vm2, %v397_v18 }
 0x1b2   : > { %v453_v19 = vpop.f32.mrf.mxu1 }
 0x1b3   : > { %v454_v31 = vadd.f32 %v453_v19, %v406_v30 }
 0x1b8   : > { %v462_v21 = vpop.f32.mrf.mxu2 }
 0x1b9   : > { %v463_v22 = vadd.f32 %v462_v21, %v421_v20  ;;  %v755_v20 = vpop.permute.xlu0 %754 }
 0x1ba   : > { %v456_v23 = vpop.f32.mrf.mxu1 }
 0x1bb   : > { %1168 = vtanh.f32 %v463_v22  ;;  %v457_v28 = vadd.f32 %v456_v23, %v411_v26  ;;  %v624_v22 = vld [vmem:[%s1701_s3 + $0x120] sm:$0xff] }
 0x1c1   : > { %v1169_v24 = vpop.eup %1168 }
 0x1c2   : > { %v459_v27 = vpop.f32.mrf.mxu1  ;;  %491 = vmatpush.msrb.mxu2 %v1169_v24  ;;  %v750_v24 = vpop.permute.xlu1 %749 }
 0x1c3   : > { %v460_v29 = vadd.f32 %v459_v27, %v416_v25  ;;  %v745_v25 = vpop.permute.xlu2 %744  ;;  %v625_v27 = vld [vmem:[%s1701_s3 + $0x128] sm:$0xff]  ;;  %v759_v30 = vmul.f32 %v1541_v56, %v750_v24 }
 0x1c5   : > { %1170 = vtanh.f32 %v460_v29 }
 0x1c6   : > { %1172 = vtanh.f32 %v457_v28  ;;  %v827_v28 = vpop.permute.xlu0 %826 }
 0x1c7   : > { %1174 = vtanh.f32 %v454_v31  ;;  %v760_v31 = vmul.f32 %v1541_v56, %v755_v20 }
 0x1c8   : > { %1176 = vtanh.f32 %v284_v39 }
 0x1ca   : > { %v740_v29 = vpop.permute.xlu1 %739 }
 0x1cb   : > { %v1171_v32 = vpop.eup %1170  ;;  %v757_v36 = vmul.f32 %v1541_v56, %v740_v29  ;;  %v822_v39 = vpop.permute.xlu2 %821 }
 0x1cc   : > { %492 = vmatpush.msrb.mxu2 %v1171_v32  ;;  %v1173_v33 = vpop.eup %1172  ;;  %v758_v32 = vmul.f32 %v1541_v56, %v745_v25 }
 0x1cd   : > { %v1175_v35 = vpop.eup %1174 }
 0x1ce   : > { %493 = vmatpush.msrb.mxu2 %v1173_v33  ;;  %v1177_v44 = vpop.eup %1176 }
 0x1d0   : > { %494 = vmatpush.msrb.mxu2 %v1175_v35  ;;  %v626_v35 = vld [vmem:[%s1701_s3 + $0x130] sm:$0xff] }
 0x1d1   : > { %1071 = vmatmul.msk.f32.vlgmr.msrb.gmra.mxu2 %vm423_vm2, %v469_v34 }
 0x254   : > { %v496_v41 = vpop.f32.mrf.mxu2 }
 0x255   : > { %v497_v42 = vadd.f32 %v496_v41, %v474_v40 }
 0x257   : > { %v499_v45 = vmul.f32 %v1177_v44, %v497_v42  ;;  %v817_v44 = vpop.permute.xlu0 %816 }
 0x259   : > { %v1574_v46 = vadd.f32 %v499_v45, %v1510_v43  ;;  %v518_v43 = vld [vmem:[%s1701_s3 + $0xd0] sm:$0xff] }
 0x25b   : > { %1072 = vmatpush.msk.msra.mxu3 %vm331_vm0, %v1574_v46 }
 0x25c   : > { %1073 = vmatmul.msk.f32.vlgmr.msra.gmra.mxu3 %vm318_vm1, %v516_v47  ;;  %v812_v47 = vpop.permute.xlu1 %811 }
 0x25d   : > { %1082 = vmatpush.msk.msrb.mxu3 %vm331_vm0, %v261_v48 }
 0x264   : > { %1074 = vmatmul.msk.f32.gmra.mxu3 %vm318_vm1, %v517_v49  ;;  %v627_v49 = vld [vmem:[%s1701_s3 + $0x138] sm:$0xff] }
 0x26c   : > { %1075 = vmatmul.msk.f32.gmra.mxu3 %vm318_vm1, %v518_v43 }
 0x274   : > { %1076 = vmatmul.msk.f32.gmra.mxu3 %vm318_vm1, %v519_v50 }
 0x27c   : > { %1083 = vmatmul.msk.f32.vlgmr.msrb.gmra.mxu3 %vm318_vm1, %v729_v51 }
 0x284   : > { %1084 = vmatmul.msk.f32.gmra.mxu3 %vm318_vm1, %v730_v52  ;;  %v837_v52 = vld [vmem:[%s1701_s3 + $0x1e0] sm:$0xff] }
 0x28c   : > { %1085 = vmatmul.msk.f32.gmra.mxu3 %vm318_vm1, %v731_v53 }
 0x294   : > { %1086 = vmatmul.msk.f32.gmra.mxu3 %vm318_vm1, %v732_v54  ;;  %v838_v54 = vld [vmem:[%s1701_s3 + $0x1e8] sm:$0xff] }
 0x2df   : > { %v580_v55 = vpop.f32.mrf.mxu3 }
 0x2e0   : > { %v581_v9 = vadd.f32 %v580_v55, %v544_v5  ;;  %v839_v55 = vld [vmem:[%s1701_s3 + $0x1f0] sm:$0xff] }
 0x2e2   : > { %v616_v15 = vadd.f32 %v599_v14, %v581_v9 }
 0x2e7   : > { %v583_v58 = vpop.f32.mrf.mxu3 }
 0x2e8   : > { %v584_v6 = vadd.f32 %v583_v58, %v545_v1 }
 0x2ea   : > { %v617_v13 = vadd.f32 %v604_v12, %v584_v6 }
 0x2ef   : > { %v586_v61 = vpop.f32.mrf.mxu3 }
 0x2f0   : > { %v587_v3 = vadd.f32 %v586_v61, %v546_v0  ;;  %v650_v61 = vpop.permute.xlu2 %649 }
 0x2f2   : > { %v618_v10 = vadd.f32 %v609_v8, %v587_v3 }
 0x2f7   : > { %v589_v4 = vpop.f32.mrf.mxu3 }
 0x2f8   : > { %v590_v7 = vadd.f32 %v589_v4, %v547_v2  ;;  %v640_v2 = vpop.permute.xlu1 %639  ;;  %v635_v5 = vpop.permute.xlu2 %634 }
 0x2fa   : > { %v619_v11 = vadd.f32 %v614_v62, %v590_v7  ;;  %v645_v62 = vpop.permute.xlu0 %644 }
 0x2fc   : > { %1178 = vtanh.f32 %v619_v11  ;;  %v697_v11 = vld [vmem:[%s1701_s3 + $0x160] sm:$0xf] }
 0x2fd   : > { %1180 = vtanh.f32 %v618_v10 }
 0x2fe   : > { %1182 = vtanh.f32 %v617_v13 }
 0x2ff   : > { %v793_v16 = vpop.f32.mrf.mxu3  ;;  %1184 = vtanh.f32 %v616_v15 }
 0x300   : > { %v794_v40 = vadd.f32 %v793_v16, %v757_v36  ;;  %v858_v15 = vpop.permute.xlu1 %857 }
 0x302   : > { %v1179_v17 = vpop.eup %1178  ;;  %v829_v48 = vadd.f32 %v812_v47, %v794_v40  ;;  %v863_v14 = vpop.permute.xlu0 %862 }
 0x303   : > { %676 = vmatpush.msra.mxu2 %v1179_v17  ;;  %v1181_v18 = vpop.eup %1180 }
 0x304   : > { %v1183_v19 = vpop.eup %1182 }
 0x305   : > { %677 = vmatpush.msra.mxu2 %v1181_v18  ;;  %v1185_v23 = vpop.eup %1184 }
 0x307   : > { %678 = vmatpush.msra.mxu2 %v1183_v19  ;;  %v796_v21 = vpop.f32.mrf.mxu3  ;;  %v853_v19 = vpop.permute.xlu2 %852 }
 0x308   : > { %v797_v37 = vadd.f32 %v796_v21, %v758_v32 }
 0x309   : > { %679 = vmatpush.msra.mxu2 %v1185_v23 }
 0x30a   : > { %1077 = vmatmul.msk.f32.vlgmr.msra.gmra.mxu2 %vm423_vm2, %v624_v22  ;;  %v830_v45 = vadd.f32 %v817_v44, %v797_v37  ;;  %v848_v21 = vpop.permute.xlu0 %847 }
 0x30f   : > { %v799_v26 = vpop.f32.mrf.mxu3 }
 0x310   : > { %v800_v33 = vadd.f32 %v799_v26, %v759_v30  ;;  %v910_v26 = vld [vmem:[%s1701_s3 + $0x220] sm:$0xf]  ;;  %v512_v30 = vpop.permute.xlu2 %511 }
 0x312   : > { %1078 = vmatmul.msk.f32.gmra.mxu2 %vm423_vm2, %v625_v27  ;;  %v831_v41 = vadd.f32 %v822_v39, %v800_v33  ;;  %v702_v33 = vpop.permute.xlu0 %701 }
 0x317   : > { %v802_v34 = vpop.f32.mrf.mxu3 }
 0x318   : > { %v803_v38 = vadd.f32 %v802_v34, %v760_v31 }
 0x31a   : > { %v832_v42 = vadd.f32 %v827_v28, %v803_v38  ;;  %1079 = vmatmul.msk.f32.gmra.mxu2 %vm423_vm2, %v626_v35  ;;  %v505_v28 = vpop.permute.xlu1 %504 }
 0x31b   : > { %v507_v29 = vmul.f32 %v1541_v56, %v505_v28 }
 0x31c   : > { %1186 = vtanh.f32 %v832_v42 }
 0x31d   : > { %1188 = vtanh.f32 %v831_v41  ;;  %v514_v31 = vadd.f32 %v512_v30, %v507_v29 }
 0x31e   : > { %1190 = vtanh.f32 %v830_v45 }
 0x31f   : > { %1192 = vtanh.f32 %v829_v48 }
 0x322   : > { %v1187_v43 = vpop.eup %1186  ;;  %1080 = vmatmul.msk.f32.gmra.mxu2 %vm423_vm2, %v627_v49  ;;  %v915_v37 = vpop.permute.xlu1 %914 }
 0x323   : > { %889 = vmatpush.msrb.mxu1 %v1187_v43  ;;  %v1189_v50 = vpop.eup %1188 }
 0x324   : > { %v1191_v51 = vpop.eup %1190 }
 0x325   : > { %890 = vmatpush.msrb.mxu1 %v1189_v50  ;;  %v1193_v53 = vpop.eup %1192 }
 0x327   : > { %891 = vmatpush.msrb.mxu1 %v1191_v51 }
 0x329   : > { %892 = vmatpush.msrb.mxu1 %v1193_v53 }
 0x32a   : > { %1087 = vmatmul.msk.f32.vlgmr.msrb.gmra.mxu1 %vm423_vm2, %v837_v52 }
 0x332   : > { %1088 = vmatmul.msk.f32.gmra.mxu1 %vm423_vm2, %v838_v54 }
 0x33a   : > { %1089 = vmatmul.msk.f32.gmra.mxu1 %vm423_vm2, %v839_v55 }
 0x342   : > { %1090 = vmatmul.msk.f32.gmra.mxu1 %vm423_vm2, %v840_v57 }
 0x38d   : > { %v681_v58 = vpop.f32.mrf.mxu2 }
 0x38e   : > { %v682_v6 = vadd.f32 %v681_v58, %v635_v5 }
 0x395   : > { %v684_v59 = vpop.f32.mrf.mxu2 }
 0x396   : > { %v685_v4 = vadd.f32 %v684_v59, %v640_v2 }
 0x39d   : > { %v687_v60 = vpop.f32.mrf.mxu2 }
 0x39e   : > { %v688_v0 = vadd.f32 %v687_v60, %v645_v62 }
 0x3a5   : > { %v690_v63 = vpop.f32.mrf.mxu2 }
 0x3a6   : > { %v691_v1 = vadd.f32 %v690_v63, %v650_v61 }
 0x3a7   : > { %v894_v3 = vpop.f32.mrf.mxu1 }
 0x3a8   : > { %1194 = vtanh.f32 %v691_v1  ;;  %v895_v22 = vadd.f32 %v894_v3, %v848_v21 }
 0x3a9   : > { %1196 = vtanh.f32 %v688_v0 }
 0x3aa   : > { %1198 = vtanh.f32 %v685_v4 }
 0x3ab   : > { %1200 = vtanh.f32 %v682_v6 }
 0x3ae   : > { %v1195_v7 = vpop.eup %1194 }
 0x3af   : > { %719 = vmatpush.msrb.mxu0 %v1195_v7  ;;  %v897_v8 = vpop.f32.mrf.mxu1  ;;  %v1197_v9 = vpop.eup %1196 }
 0x3b0   : > { %v1199_v10 = vpop.eup %1198  ;;  %v898_v20 = vadd.f32 %v897_v8, %v853_v19 }
 0x3b1   : > { %720 = vmatpush.msrb.mxu0 %v1197_v9  ;;  %v1201_v12 = vpop.eup %1200 }
 0x3b3   : > { %721 = vmatpush.msrb.mxu0 %v1199_v10 }
 0x3b5   : > { %722 = vmatpush.msrb.mxu0 %v1201_v12 }
 0x3b6   : > { %1081 = vmatmul.msk.f32.vlgmr.msrb.gmra.mxu0 %vm423_vm2, %v697_v11 }
 0x3b7   : > { %v900_v13 = vpop.f32.mrf.mxu1 }
 0x3b8   : > { %v901_v17 = vadd.f32 %v900_v13, %v858_v15 }
 0x3bf   : > { %v903_v16 = vpop.f32.mrf.mxu1 }
 0x3c0   : > { %v904_v18 = vadd.f32 %v903_v16, %v863_v14 }
 0x3c2   : > { %1202 = vtanh.f32 %v904_v18 }
 0x3c3   : > { %1204 = vtanh.f32 %v901_v17 }
 0x3c4   : > { %1206 = vtanh.f32 %v898_v20 }
 0x3c5   : > { %1208 = vtanh.f32 %v895_v22 }
 0x3c6   : > { %1210 = vtanh.f32 %v514_v31 }
 0x3c8   : > { %v1203_v23 = vpop.eup %1202 }
 0x3c9   : > { %932 = vmatpush.msra.mxu0 %v1203_v23  ;;  %v1205_v24 = vpop.eup %1204 }
 0x3ca   : > { %v1207_v25 = vpop.eup %1206 }
 0x3cb   : > { %933 = vmatpush.msra.mxu0 %v1205_v24  ;;  %v1209_v27 = vpop.eup %1208 }
 0x3cc   : > { %v1211_v35 = vpop.eup %1210 }
 0x3cd   : > { %934 = vmatpush.msra.mxu0 %v1207_v25 }
 0x3cf   : > { %935 = vmatpush.msra.mxu0 %v1209_v27 }
 0x3d0   : > { %1091 = vmatmul.msk.f32.vlgmr.msra.gmra.mxu0 %vm423_vm2, %v910_v26 }
 0x433   : > { %v724_v32 = vpop.f32.mrf.mxu0 }
 0x434   : > { %v725_v34 = vadd.f32 %v724_v32, %v702_v33 }
 0x436   : > { %v727_v36 = vmul.f32 %v1211_v35, %v725_v34 }
 0x438   : > { %v728_v56 = vadd.f32 %v727_v36, %v1574_v46 }
 0x44d   : > { %v937_v38 = vpop.f32.mrf.mxu0 }
 0x44e   : > { %v938_v39 = vadd.f32 %v937_v38, %v915_v37 }
 0x450   : > { %v940_v40 = vadd.f32 %v938_v39, %v728_v56 }
 0x452   : > { %941 = vst [vmem:[%s242_s8] sm:$0xf] %v940_v40 }
 0x453   : > { %1239 = shalt.err (!%p1236_p5)
}
 0x454   : > { %1100 = dma.vmem_to_hbm [thread:$0]  (%p1358_p4), %s957_s10, 64, %s959_s11, %s943_s18  }
 0x455 PF: > { %p1106_p6 = scmp.ge.s32.totalorder %s1290_s20, 2  ;;  %s970_s6 = sand.u32 1, %s1270_s15  }
 0x456   : > { %s971_s24 = scalar_lea.sflag [#allocation3], %s970_s6 }
 0x457   : > { %p1103_p7 = pnand %p1106_p6, %p1365_p8 }
 0x459   : > { %p1104_p9 = pneg %p1103_p7 }
 0x45b   : > { %1265 = dma.done.wait (%p1104_p9), %s971_s24, 64  }
 0x45c   : > { %1267 = vsyncadd (%p1104_p9), %s971_s24, 4294967232  ;;  %s17_s20 = sadd.s32 1, %s1290_s20   ;;  %s1705_s15 = smov %s1274_s16 }
 0x45d   : > { %p14_p10 = scmp.ge.s32.totalorder %s17_s20, 4   ;;  %s1706_s16 = smov %s1278_s17 }
 0x45e   : > { %s1707_s17 = smov %s1371_s28  ;;  %s1708_s18 = smov %s1286_s19 }
 0x45f   : > { %s1709_s19 = smov %s1711_s23  ;;  %16 = sbr.rel (!%p14_p10) target bundleno = 4 (0x4), region = 77 }
 0x464   :  { %977 = vsyncpa [#allocation3], 1 }
 0x465   :  { %979 = vsyncpa [#allocation3 + $0x1], 1 }

</bundles_post_ra>
